<compile_context>
chip_gen: v6e
topology: v6e:2x2x1
jax: 0.10.0
libtpu: 0.0.40
codegen_flags: <defaults>
</compile_context>

<pallas_src>
import functools

import jax
import jax.numpy as jnp
import numpy as np
from jax import lax
from jax.experimental import pallas as pl
from jax.experimental.pallas import tpu as pltpu

EPS = 1e-5


def _bn_relu(v, gamma, beta):
    # Training-mode batchnorm over the flattened batch*spatial (lane) axis,
    # per channel (sublane row).  Single traversal: mean + E[x^2] in f32.
    m = jnp.mean(v, axis=1, keepdims=True)
    ex2 = jnp.mean(v * v, axis=1, keepdims=True)
    var = jnp.maximum(ex2 - m * m, 0.0)
    return jnp.maximum((v - m) * lax.rsqrt(var + EPS) * gamma + beta, 0.0)


def fire_kernel(x_ref, ws1_ref, bs1_ref, gs_ref, bts_ref,
                wfe_ref, bfe_ref, ge_ref, bte_ref, mask_ref,
                out_ref, *, n_samples, height, width):
    hw = height * width

    # Gather samples on the lane axis: (Cin, N*H*W), lane-dense, 128-aligned.
    x = jnp.concatenate([x_ref[n] for n in range(n_samples)], axis=1)

    # ---- squeeze: 1x1 conv == (Cs, Cin) @ (Cin, N*H*W) ---------------------
    s = jnp.dot(ws1_ref[...], x, preferred_element_type=jnp.float32) + bs1_ref[...]
    s = _bn_relu(s, gs_ref[...], bts_ref[...])                 # (Cs, N*H*W)

    # ---- fused expand: 9-tap im2col + single matmul ------------------------
    masks = mask_ref[...]                                      # (9, N*H*W) f32
    taps = []
    for ky in range(3):
        for kx in range(3):
            dy, dx = ky - 1, kx - 1
            t = 3 * ky + kx
            if dy == 0 and dx == 0:
                taps.append(s)                                 # centre tap: as-is
            else:
                shifted = jnp.roll(s, -(dy * width + dx), axis=1)
                taps.append(shifted * masks[t:t + 1, :])       # zero the border
    im2col = jnp.concatenate(taps, axis=0)                     # (9*Cs, N*H*W)

    e = jnp.dot(wfe_ref[...], im2col,
                preferred_element_type=jnp.float32) + bfe_ref[...]  # (2*Ce, N*H*W)
    e = _bn_relu(e, ge_ref[...], bte_ref[...])

    # ---- store: per-sample, lane-aligned (2*Ce, H*W) slabs -----------------
    for n in range(n_samples):
        out_ref[n] = e[:, n * hw:(n + 1) * hw].astype(out_ref.dtype)


@jax.jit
def fire_forward(x_nchw, params):
    """x_nchw: (N, Cin, H, W) float32.  Returns (N, 2*Ce, H, W)."""
    N, Cin, H, W = x_nchw.shape
    Ce2 = params["wfe"].shape[0]
    HW = H * W

    x = x_nchw.reshape(N, Cin, HW)        # free reshape (row-major contiguous)

    # 3x3 border-validity masks, one (N*H*W,) row per tap.  Pure function of
    # static shapes -> constant folded under jit.
    p = jnp.arange(N * HW, dtype=jnp.int32)
    hh = (p % HW) // W
    ww = p % W
    rows = []
    for ky in range(3):
        for kx in range(3):
            dy, dx = ky - 1, kx - 1
            rows.append((hh + dy >= 0) & (hh + dy < H) &
                        (ww + dx >= 0) & (ww + dx < W))
    masks = jnp.stack(rows, axis=0).astype(jnp.float32)        # (9, N*H*W)

    kernel = functools.partial(fire_kernel, n_samples=N, height=H, width=W)
    vmem = pl.BlockSpec(memory_space=pltpu.MemorySpace.VMEM)
    # TODO(synk): for production Fire shapes, tile over N/H with a grid and a
    # two-pass batchnorm (per-channel sum/sumsq stats pass, then normalize);
    # batch statistics make a naive single-pass tiling incorrect, and
    # whole-array residency would not fit v7x's 64 MiB VMEM at large shapes.
    out = pl.pallas_call(
        kernel,
        out_shape=jax.ShapeDtypeStruct((N, Ce2, HW), jnp.float32),
        in_specs=[vmem] * 10,
        out_specs=vmem,
    )(x, params["ws1"], params["bs1"], params["gs"], params["bts"],
      params["wfe"], params["bfe"], params["ge"], params["bte"], masks)
    return out.reshape(N, Ce2, H, W)      # free reshape back to NCHW


# ------------------------------- reference ----------------------------------
def fire_reference(x_nchw, p_oihw):
    def conv(x, w, b, pad):
        y = lax.conv_general_dilated(
            x, w, (1, 1), [(pad, pad), (pad, pad)],
            dimension_numbers=("NCHW", "OIHW", "NCHW"))
        return y + b[None, :, None, None]

    def bn(x, g, bt):
        m = jnp.mean(x, axis=(0, 2, 3), keepdims=True)
        v = jnp.mean((x - m) ** 2, axis=(0, 2, 3), keepdims=True)
        return (x - m) * lax.rsqrt(v + EPS) * g[None, :, None, None] + bt[None, :, None, None]

    s = jax.nn.relu(bn(conv(x_nchw, p_oihw["w_s1"], p_oihw["b_s1"], 0),
                       p_oihw["gs"], p_oihw["bts"]))
    e1 = conv(s, p_oihw["w_e1"], p_oihw["b_e1"], 0)
    e3 = conv(s, p_oihw["w_e3"], p_oihw["b_e3"], 1)
    return jax.nn.relu(bn(jnp.concatenate([e1, e3], axis=1),
                          p_oihw["ge"], p_oihw["bte"]))


if __name__ == "__main__":
    # fire(in_chn=4, squeeze_chn=8, expand_chn=16, padding=1)
    N, Cin, H, W = 2, 4, 16, 16
    Cs, Ce = 8, 16

    key = jax.random.PRNGKey(0)
    ks = jax.random.split(key, 12)
    x = jax.random.normal(ks[0], (N, Cin, H, W), jnp.float32)

    # PyTorch-style OIHW conv weights, deterministic init.
    w_s1 = jax.random.normal(ks[1], (Cs, Cin, 1, 1), jnp.float32) * 0.2
    b_s1 = jax.random.normal(ks[2], (Cs,), jnp.float32) * 0.1
    w_e1 = jax.random.normal(ks[3], (Ce, Cs, 1, 1), jnp.float32) * 0.2
    b_e1 = jax.random.normal(ks[4], (Ce,), jnp.float32) * 0.1
    w_e3 = jax.random.normal(ks[5], (Ce, Cs, 3, 3), jnp.float32) * 0.1
    b_e3 = jax.random.normal(ks[6], (Ce,), jnp.float32) * 0.1
    gs = 1.0 + 0.1 * jax.random.normal(ks[7], (Cs,), jnp.float32)
    bts = 0.1 * jax.random.normal(ks[8], (Cs,), jnp.float32)
    ge = 1.0 + 0.1 * jax.random.normal(ks[9], (2 * Ce,), jnp.float32)
    bte = 0.1 * jax.random.normal(ks[10], (2 * Ce,), jnp.float32)

    # ---- kernel-layout params (channel-major) ------------------------------
    # Fused expand weight (2*Ce, 9*Cs): rows [0:Ce] = conv_e1 on the centre
    # tap only; rows [Ce:2*Ce] = conv_e3 with columns ordered (ky, kx, c).
    we1 = w_e1[:, :, 0, 0]                                            # (Ce, Cs)
    wfe_top = jnp.concatenate(
        [jnp.zeros((Ce, 4 * Cs), jnp.float32), we1,
         jnp.zeros((Ce, 4 * Cs), jnp.float32)], axis=1)               # (Ce, 9*Cs)
    wfe_bot = jnp.transpose(w_e3, (0, 2, 3, 1)).reshape(Ce, 9 * Cs)   # (Ce, 9*Cs)
    params = {
        "ws1": w_s1[:, :, 0, 0],                                      # (Cs, Cin)
        "bs1": b_s1.reshape(Cs, 1),
        "gs": gs.reshape(Cs, 1),
        "bts": bts.reshape(Cs, 1),
        "wfe": jnp.concatenate([wfe_top, wfe_bot], axis=0),           # (2*Ce, 9*Cs)
        "bfe": jnp.concatenate([b_e1, b_e3]).reshape(2 * Ce, 1),
        "ge": ge.reshape(2 * Ce, 1),
        "bte": bte.reshape(2 * Ce, 1),
    }
    p_oihw = {"w_s1": w_s1, "b_s1": b_s1, "w_e1": w_e1, "b_e1": b_e1,
              "w_e3": w_e3, "b_e3": b_e3, "gs": gs, "bts": bts,
              "ge": ge, "bte": bte}

    out = jax.block_until_ready(fire_forward(x, params))
    ref = jax.block_until_ready(fire_reference(x, p_oihw))

    assert out.shape == (N, 2 * Ce, H, W), out.shape
    np.testing.assert_allclose(np.asarray(out), np.asarray(ref),
                               atol=2e-4, rtol=2e-4)
    print("KERNEL_OK")
</pallas_src>

<mosaic_0001>
module attributes {stable_mosaic.version = 11 : i64} {
  func.func @fire_kernel(%arg0: memref<2x4x256xf32, #tpu.memory_space<vmem>>, %arg1: memref<8x4xf32, #tpu.memory_space<vmem>>, %arg2: memref<8x1xf32, #tpu.memory_space<vmem>>, %arg3: memref<8x1xf32, #tpu.memory_space<vmem>>, %arg4: memref<8x1xf32, #tpu.memory_space<vmem>>, %arg5: memref<32x72xf32, #tpu.memory_space<vmem>>, %arg6: memref<32x1xf32, #tpu.memory_space<vmem>>, %arg7: memref<32x1xf32, #tpu.memory_space<vmem>>, %arg8: memref<32x1xf32, #tpu.memory_space<vmem>>, %arg9: memref<9x512xf32, #tpu.memory_space<vmem>>, %arg10: memref<2x32x256xf32, #tpu.memory_space<vmem>>) attributes {dimension_semantics = [], scalar_prefetch = 0 : i64, scratch_operands = 0 : i64, tpu.core_type = #tpu.core_type<tc>} {
    %c0 = arith.constant 0 : index
    %c0_0 = arith.constant 0 : index
    %c0_1 = arith.constant 0 : index
    %0 = vector.load %arg0[%c0, %c0_0, %c0_1] : memref<2x4x256xf32, #tpu.memory_space<vmem>>, vector<1x4x256xf32>
    %1 = vector.shape_cast %0 : vector<1x4x256xf32> to vector<4x256xf32>
    %c1 = arith.constant 1 : index
    %c0_2 = arith.constant 0 : index
    %c0_3 = arith.constant 0 : index
    %2 = vector.load %arg0[%c1, %c0_2, %c0_3] : memref<2x4x256xf32, #tpu.memory_space<vmem>>, vector<1x4x256xf32>
    %3 = vector.shape_cast %2 : vector<1x4x256xf32> to vector<4x256xf32>
    %4 = tpu.concatenate %1, %3 in 1 : vector<4x256xf32>, vector<4x256xf32> -> vector<4x512xf32>
    %c0_4 = arith.constant 0 : index
    %c0_5 = arith.constant 0 : index
    %5 = vector.load %arg1[%c0_4, %c0_5] : memref<8x4xf32, #tpu.memory_space<vmem>>, vector<8x4xf32>
    %cst = arith.constant dense<0.000000e+00> : vector<8x512xf32>
    %6 = tpu.matmul %5, %4, %cst {dimension_numbers = #tpu.dot_dimension_numbers<[1], [0], [0], [1], [0, 0, 1, 1], [], []>} : vector<8x4xf32>, vector<4x512xf32>, vector<8x512xf32> -> vector<8x512xf32>
    %c0_6 = arith.constant 0 : index
    %c0_7 = arith.constant 0 : index
    %7 = vector.load %arg2[%c0_6, %c0_7] : memref<8x1xf32, #tpu.memory_space<vmem>>, vector<8x1xf32>
    %8 = vector.broadcast %7 : vector<8x1xf32> to vector<8x512xf32>
    %9 = arith.addf %6, %8 : vector<8x512xf32>
    %c0_8 = arith.constant 0 : index
    %c0_9 = arith.constant 0 : index
    %10 = vector.load %arg3[%c0_8, %c0_9] : memref<8x1xf32, #tpu.memory_space<vmem>>, vector<8x1xf32>
    %c0_10 = arith.constant 0 : index
    %c0_11 = arith.constant 0 : index
    %11 = vector.load %arg4[%c0_10, %c0_11] : memref<8x1xf32, #tpu.memory_space<vmem>>, vector<8x1xf32>
    %cst_12 = arith.constant dense<0.000000e+00> : vector<8xf32>
    %12 = vector.multi_reduction <add>, %9, %cst_12 [1] : vector<8x512xf32> to vector<8xf32>
    %13 = vector.shape_cast %12 : vector<8xf32> to vector<8x1xf32>
    %cst_13 = arith.constant 5.120000e+02 : f32
    %14 = vector.broadcast %cst_13 : f32 to vector<8x1xf32>
    %15 = arith.divf %13, %14 : vector<8x1xf32>
    %16 = arith.mulf %9, %9 : vector<8x512xf32>
    %cst_14 = arith.constant dense<0.000000e+00> : vector<8xf32>
    %17 = vector.multi_reduction <add>, %16, %cst_14 [1] : vector<8x512xf32> to vector<8xf32>
    %18 = vector.shape_cast %17 : vector<8xf32> to vector<8x1xf32>
    %cst_15 = arith.constant 5.120000e+02 : f32
    %19 = vector.broadcast %cst_15 : f32 to vector<8x1xf32>
    %20 = arith.divf %18, %19 : vector<8x1xf32>
    %21 = arith.mulf %15, %15 : vector<8x1xf32>
    %22 = arith.subf %20, %21 : vector<8x1xf32>
    %cst_16 = arith.constant 0.000000e+00 : f32
    %23 = vector.broadcast %cst_16 : f32 to vector<8x1xf32>
    %24 = arith.maximumf %22, %23 : vector<8x1xf32>
    %25 = vector.broadcast %15 : vector<8x1xf32> to vector<8x512xf32>
    %26 = arith.subf %9, %25 : vector<8x512xf32>
    %cst_17 = arith.constant 9.99999974E-6 : f32
    %27 = vector.broadcast %cst_17 : f32 to vector<8x1xf32>
    %28 = arith.addf %24, %27 : vector<8x1xf32>
    %29 = math.rsqrt %28 : vector<8x1xf32>
    %30 = vector.broadcast %29 : vector<8x1xf32> to vector<8x512xf32>
    %31 = arith.mulf %26, %30 : vector<8x512xf32>
    %32 = vector.broadcast %10 : vector<8x1xf32> to vector<8x512xf32>
    %33 = arith.mulf %31, %32 : vector<8x512xf32>
    %34 = vector.broadcast %11 : vector<8x1xf32> to vector<8x512xf32>
    %35 = arith.addf %33, %34 : vector<8x512xf32>
    %cst_18 = arith.constant 0.000000e+00 : f32
    %36 = vector.broadcast %cst_18 : f32 to vector<8x512xf32>
    %37 = arith.maximumf %35, %36 : vector<8x512xf32>
    %c0_19 = arith.constant 0 : index
    %c0_20 = arith.constant 0 : index
    %38 = vector.load %arg9[%c0_19, %c0_20] : memref<9x512xf32, #tpu.memory_space<vmem>>, vector<9x512xf32>
    %39 = vector.extract_strided_slice %37 {offsets = [0, 495], sizes = [8, 17], strides = [1, 1]} : vector<8x512xf32> to vector<8x17xf32>
    %40 = vector.extract_strided_slice %37 {offsets = [0, 0], sizes = [8, 495], strides = [1, 1]} : vector<8x512xf32> to vector<8x495xf32>
    %41 = tpu.concatenate %39, %40 in 1 : vector<8x17xf32>, vector<8x495xf32> -> vector<8x512xf32>
    %42 = vector.extract_strided_slice %38 {offsets = [0, 0], sizes = [1, 512], strides = [1, 1]} : vector<9x512xf32> to vector<1x512xf32>
    %43 = vector.broadcast %42 : vector<1x512xf32> to vector<8x512xf32>
    %44 = arith.mulf %41, %43 : vector<8x512xf32>
    %45 = vector.extract_strided_slice %37 {offsets = [0, 496], sizes = [8, 16], strides = [1, 1]} : vector<8x512xf32> to vector<8x16xf32>
    %46 = vector.extract_strided_slice %37 {offsets = [0, 0], sizes = [8, 496], strides = [1, 1]} : vector<8x512xf32> to vector<8x496xf32>
    %47 = tpu.concatenate %45, %46 in 1 : vector<8x16xf32>, vector<8x496xf32> -> vector<8x512xf32>
    %48 = vector.extract_strided_slice %38 {offsets = [1, 0], sizes = [1, 512], strides = [1, 1]} : vector<9x512xf32> to vector<1x512xf32>
    %49 = vector.broadcast %48 : vector<1x512xf32> to vector<8x512xf32>
    %50 = arith.mulf %47, %49 : vector<8x512xf32>
    %51 = vector.extract_strided_slice %37 {offsets = [0, 497], sizes = [8, 15], strides = [1, 1]} : vector<8x512xf32> to vector<8x15xf32>
    %52 = vector.extract_strided_slice %37 {offsets = [0, 0], sizes = [8, 497], strides = [1, 1]} : vector<8x512xf32> to vector<8x497xf32>
    %53 = tpu.concatenate %51, %52 in 1 : vector<8x15xf32>, vector<8x497xf32> -> vector<8x512xf32>
    %54 = vector.extract_strided_slice %38 {offsets = [2, 0], sizes = [1, 512], strides = [1, 1]} : vector<9x512xf32> to vector<1x512xf32>
    %55 = vector.broadcast %54 : vector<1x512xf32> to vector<8x512xf32>
    %56 = arith.mulf %53, %55 : vector<8x512xf32>
    %57 = vector.extract_strided_slice %37 {offsets = [0, 511], sizes = [8, 1], strides = [1, 1]} : vector<8x512xf32> to vector<8x1xf32>
    %58 = vector.extract_strided_slice %37 {offsets = [0, 0], sizes = [8, 511], strides = [1, 1]} : vector<8x512xf32> to vector<8x511xf32>
    %59 = tpu.concatenate %57, %58 in 1 : vector<8x1xf32>, vector<8x511xf32> -> vector<8x512xf32>
    %60 = vector.extract_strided_slice %38 {offsets = [3, 0], sizes = [1, 512], strides = [1, 1]} : vector<9x512xf32> to vector<1x512xf32>
    %61 = vector.broadcast %60 : vector<1x512xf32> to vector<8x512xf32>
    %62 = arith.mulf %59, %61 : vector<8x512xf32>
    %63 = vector.extract_strided_slice %37 {offsets = [0, 1], sizes = [8, 511], strides = [1, 1]} : vector<8x512xf32> to vector<8x511xf32>
    %64 = vector.extract_strided_slice %37 {offsets = [0, 0], sizes = [8, 1], strides = [1, 1]} : vector<8x512xf32> to vector<8x1xf32>
    %65 = tpu.concatenate %63, %64 in 1 : vector<8x511xf32>, vector<8x1xf32> -> vector<8x512xf32>
    %66 = vector.extract_strided_slice %38 {offsets = [5, 0], sizes = [1, 512], strides = [1, 1]} : vector<9x512xf32> to vector<1x512xf32>
    %67 = vector.broadcast %66 : vector<1x512xf32> to vector<8x512xf32>
    %68 = arith.mulf %65, %67 : vector<8x512xf32>
    %69 = vector.extract_strided_slice %37 {offsets = [0, 15], sizes = [8, 497], strides = [1, 1]} : vector<8x512xf32> to vector<8x497xf32>
    %70 = vector.extract_strided_slice %37 {offsets = [0, 0], sizes = [8, 15], strides = [1, 1]} : vector<8x512xf32> to vector<8x15xf32>
    %71 = tpu.concatenate %69, %70 in 1 : vector<8x497xf32>, vector<8x15xf32> -> vector<8x512xf32>
    %72 = vector.extract_strided_slice %38 {offsets = [6, 0], sizes = [1, 512], strides = [1, 1]} : vector<9x512xf32> to vector<1x512xf32>
    %73 = vector.broadcast %72 : vector<1x512xf32> to vector<8x512xf32>
    %74 = arith.mulf %71, %73 : vector<8x512xf32>
    %75 = vector.extract_strided_slice %37 {offsets = [0, 16], sizes = [8, 496], strides = [1, 1]} : vector<8x512xf32> to vector<8x496xf32>
    %76 = vector.extract_strided_slice %37 {offsets = [0, 0], sizes = [8, 16], strides = [1, 1]} : vector<8x512xf32> to vector<8x16xf32>
    %77 = tpu.concatenate %75, %76 in 1 : vector<8x496xf32>, vector<8x16xf32> -> vector<8x512xf32>
    %78 = vector.extract_strided_slice %38 {offsets = [7, 0], sizes = [1, 512], strides = [1, 1]} : vector<9x512xf32> to vector<1x512xf32>
    %79 = vector.broadcast %78 : vector<1x512xf32> to vector<8x512xf32>
    %80 = arith.mulf %77, %79 : vector<8x512xf32>
    %81 = vector.extract_strided_slice %37 {offsets = [0, 17], sizes = [8, 495], strides = [1, 1]} : vector<8x512xf32> to vector<8x495xf32>
    %82 = vector.extract_strided_slice %37 {offsets = [0, 0], sizes = [8, 17], strides = [1, 1]} : vector<8x512xf32> to vector<8x17xf32>
    %83 = tpu.concatenate %81, %82 in 1 : vector<8x495xf32>, vector<8x17xf32> -> vector<8x512xf32>
    %84 = vector.extract_strided_slice %38 {offsets = [8, 0], sizes = [1, 512], strides = [1, 1]} : vector<9x512xf32> to vector<1x512xf32>
    %85 = vector.broadcast %84 : vector<1x512xf32> to vector<8x512xf32>
    %86 = arith.mulf %83, %85 : vector<8x512xf32>
    %87 = tpu.concatenate %44, %50, %56, %62, %37, %68, %74, %80, %86 in 0 : vector<8x512xf32>, vector<8x512xf32>, vector<8x512xf32>, vector<8x512xf32>, vector<8x512xf32>, vector<8x512xf32>, vector<8x512xf32>, vector<8x512xf32>, vector<8x512xf32> -> vector<72x512xf32>
    %c0_21 = arith.constant 0 : index
    %c0_22 = arith.constant 0 : index
    %88 = vector.load %arg5[%c0_21, %c0_22] : memref<32x72xf32, #tpu.memory_space<vmem>>, vector<32x72xf32>
    %cst_23 = arith.constant dense<0.000000e+00> : vector<32x512xf32>
    %89 = tpu.matmul %88, %87, %cst_23 {dimension_numbers = #tpu.dot_dimension_numbers<[1], [0], [0], [1], [0, 0, 1, 1], [], []>} : vector<32x72xf32>, vector<72x512xf32>, vector<32x512xf32> -> vector<32x512xf32>
    %c0_24 = arith.constant 0 : index
    %c0_25 = arith.constant 0 : index
    %90 = vector.load %arg6[%c0_24, %c0_25] : memref<32x1xf32, #tpu.memory_space<vmem>>, vector<32x1xf32>
    %91 = vector.broadcast %90 : vector<32x1xf32> to vector<32x512xf32>
    %92 = arith.addf %89, %91 : vector<32x512xf32>
    %c0_26 = arith.constant 0 : index
    %c0_27 = arith.constant 0 : index
    %93 = vector.load %arg7[%c0_26, %c0_27] : memref<32x1xf32, #tpu.memory_space<vmem>>, vector<32x1xf32>
    %c0_28 = arith.constant 0 : index
    %c0_29 = arith.constant 0 : index
    %94 = vector.load %arg8[%c0_28, %c0_29] : memref<32x1xf32, #tpu.memory_space<vmem>>, vector<32x1xf32>
    %cst_30 = arith.constant dense<0.000000e+00> : vector<32xf32>
    %95 = vector.multi_reduction <add>, %92, %cst_30 [1] : vector<32x512xf32> to vector<32xf32>
    %96 = vector.shape_cast %95 : vector<32xf32> to vector<32x1xf32>
    %cst_31 = arith.constant 5.120000e+02 : f32
    %97 = vector.broadcast %cst_31 : f32 to vector<32x1xf32>
    %98 = arith.divf %96, %97 : vector<32x1xf32>
    %99 = arith.mulf %92, %92 : vector<32x512xf32>
    %cst_32 = arith.constant dense<0.000000e+00> : vector<32xf32>
    %100 = vector.multi_reduction <add>, %99, %cst_32 [1] : vector<32x512xf32> to vector<32xf32>
    %101 = vector.shape_cast %100 : vector<32xf32> to vector<32x1xf32>
    %cst_33 = arith.constant 5.120000e+02 : f32
    %102 = vector.broadcast %cst_33 : f32 to vector<32x1xf32>
    %103 = arith.divf %101, %102 : vector<32x1xf32>
    %104 = arith.mulf %98, %98 : vector<32x1xf32>
    %105 = arith.subf %103, %104 : vector<32x1xf32>
    %cst_34 = arith.constant 0.000000e+00 : f32
    %106 = vector.broadcast %cst_34 : f32 to vector<32x1xf32>
    %107 = arith.maximumf %105, %106 : vector<32x1xf32>
    %108 = vector.broadcast %98 : vector<32x1xf32> to vector<32x512xf32>
    %109 = arith.subf %92, %108 : vector<32x512xf32>
    %cst_35 = arith.constant 9.99999974E-6 : f32
    %110 = vector.broadcast %cst_35 : f32 to vector<32x1xf32>
    %111 = arith.addf %107, %110 : vector<32x1xf32>
    %112 = math.rsqrt %111 : vector<32x1xf32>
    %113 = vector.broadcast %112 : vector<32x1xf32> to vector<32x512xf32>
    %114 = arith.mulf %109, %113 : vector<32x512xf32>
    %115 = vector.broadcast %93 : vector<32x1xf32> to vector<32x512xf32>
    %116 = arith.mulf %114, %115 : vector<32x512xf32>
    %117 = vector.broadcast %94 : vector<32x1xf32> to vector<32x512xf32>
    %118 = arith.addf %116, %117 : vector<32x512xf32>
    %cst_36 = arith.constant 0.000000e+00 : f32
    %119 = vector.broadcast %cst_36 : f32 to vector<32x512xf32>
    %120 = arith.maximumf %118, %119 : vector<32x512xf32>
    %121 = vector.extract_strided_slice %120 {offsets = [0, 0], sizes = [32, 256], strides = [1, 1]} : vector<32x512xf32> to vector<32x256xf32>
    %c0_37 = arith.constant 0 : index
    %c0_38 = arith.constant 0 : index
    %c0_39 = arith.constant 0 : index
    %122 = vector.load %arg10[%c0_37, %c0_38, %c0_39] : memref<2x32x256xf32, #tpu.memory_space<vmem>>, vector<1x32x256xf32>
    %123 = vector.shape_cast %122 : vector<1x32x256xf32> to vector<32x256xf32>
    %124 = vector.shape_cast %121 : vector<32x256xf32> to vector<1x32x256xf32>
    tpu.vector_store %arg10[%c0_37, %c0_38, %c0_39], %124 {strides = array<i32>} : memref<2x32x256xf32, #tpu.memory_space<vmem>>, vector<1x32x256xf32>,
    %125 = vector.extract_strided_slice %120 {offsets = [0, 256], sizes = [32, 256], strides = [1, 1]} : vector<32x512xf32> to vector<32x256xf32>
    %c1_40 = arith.constant 1 : index
    %c0_41 = arith.constant 0 : index
    %c0_42 = arith.constant 0 : index
    %126 = vector.load %arg10[%c1_40, %c0_41, %c0_42] : memref<2x32x256xf32, #tpu.memory_space<vmem>>, vector<1x32x256xf32>
    %127 = vector.shape_cast %126 : vector<1x32x256xf32> to vector<32x256xf32>
    %128 = vector.shape_cast %125 : vector<32x256xf32> to vector<1x32x256xf32>
    tpu.vector_store %arg10[%c1_40, %c0_41, %c0_42], %128 {strides = array<i32>} : memref<2x32x256xf32, #tpu.memory_space<vmem>>, vector<1x32x256xf32>,
    return
  }
}

</mosaic_0001>

<bundles_post_ra>
// kernel: fire_forward.1
= control target key start
LH: loop header
LB: loop body
LE: loop exit
PB: predicated region body
PF: predicated region fallthrough
CT: control target
= control target key end

     0   :  { %vm53_vm0 = vcmask 1043456   ;;  %v1077_v2 = vmov 0.0   ;;  %v1078_v5 = vmov 0   ;;  %vm49_vm1 = vcmask 31744   ;;  %s1081_s22 = smov 113   ;;  %s1082_s23 = smov 127   ;;  %s1619_s0 = inlined_call_operand.vmem [shape: f32[2,4,256], index: 0, kind: input, shape index: {}]   ;;  %s1620_s1 = inlined_call_operand.vmem [shape: f32[8,4], index: 1, kind: input, shape index: {}]   ;;  %s1621_s2 = inlined_call_operand.vmem [shape: f32[8,1], index: 2, kind: input, shape index: {}]   ;;  %s1622_s3 = inlined_call_operand.vmem [shape: f32[8,1], index: 3, kind: input, shape index: {}]   ;;  %s1623_s4 = inlined_call_operand.vmem [shape: f32[8,1], index: 4, kind: input, shape index: {}]   ;;  %s1624_s6 = inlined_call_operand.vmem [shape: f32[32,1], index: 6, kind: input, shape index: {}]   ;;  %s1625_s7 = inlined_call_operand.vmem [shape: f32[32,1], index: 7, kind: input, shape index: {}]   ;;  %s1626_s8 = inlined_call_operand.vmem [shape: f32[32,1], index: 8, kind: input, shape index: {}]   ;;  %s1627_s9 = inlined_call_operand.vmem [shape: f32[9,512], index: 9, kind: input, shape index: {}]   ;;  %s1628_s5 = inlined_call_operand.vmem [shape: f32[32,72], index: 5, kind: input, shape index: {}]   ;;  %s1629_s10 = inlined_call_operand.vmem [shape: f32[2,32,256], index: 10, kind: output, shape index: {}]  }
   0x1   :  { %v35_v0 = vld [vmem:[%s1619_s0] sm:$0xff]  ;;  %v1026_v1 = vld [vmem:[%s1619_s0 + $0x8] sm:$0xff]  ;;  %126 = vmatprep.mubr.f32.mxu0 %v1077_v2  ;;  %197 = vmatprep.mubr.f32.mxu1 %v1077_v2  ;;  %s1083_s24 = smov 1   ;;  %s1084_s25 = smov 15   ;;  %v581_v61 = vld [vmem:[%s1624_s6 + $0x18] sm:$0xff]  ;;  %vm544_vm2 = vcmask 908288  }
   0x2   :  { %v39_v3 = vcombine.high %v35_v0, %v35_v0  ;;  %v41_v4 = vcombine.high %v1026_v1, %v1026_v1  ;;  %1063 = vset.pattern.permute.xlu0 %v1078_v5  ;;  %v43_v6 = vld [vmem:[%s1621_s2] sm:$0xff]  ;;  %1064 = vset.pattern.permute.xlu1 %v1078_v5  ;;  %s1085_s26 = smov 16   ;;  %s1086_s27 = smov 17   ;;  %v579_v60 = vld [vmem:[%s1624_s6 + $0x8] sm:$0xff]  ;;  %v796_v63 = vld [vmem:[%s1625_s7 + $0x18] sm:$0xff]  ;;  %vm506_vm3 = vcmask 916480  }
   0x3   :  { %v204_v7 = vld [vmem:[%s1622_s3] sm:$0xff]  ;;  %46 = vperm.xlu0 %1063, %v43_v6   ;;  %s1079_s3 = smov 112   ;;  %v288_v6 = vlaneseq  ;;  %vm468_vm4 = vcmask 924672   ;;  %vm430_vm5 = vcmask 1039360   ;;  %vm393_vm6 = vcmask 7168  }
   0x4   :  { %v42_v8 = vld [vmem:[%s1620_s1] sm:$0xff]  ;;  %238 = vperm.xlu1 %1064, %v204_v7   ;;  %1027 = vmatprep.subr.msk.mxu0 %vm53_vm0, %v39_v3  ;;  %v794_v3 = vld [vmem:[%s1625_s7 + $0x8] sm:$0xff]  ;;  %vm355_vm7 = vcmask 121856   ;;  %vm317_vm8 = vcmask 130048   ;;  %vm279_vm9 = vcmask 138240   ;;  %vm602_vm10 = vcmask 588800  }
   0x5   :  { %1030 = vmatprep.subr.msk.mxu1 %vm53_vm0, %v41_v4  ;;  %1028 = vmatpush1.msk.msra.mxu0 %vm53_vm0, %v35_v0  ;;  %v205_v28 = vld [vmem:[%s1623_s4] sm:$0xff]  ;;  %s1080_s4 = smov 111   ;;  %v795_v4 = vld [vmem:[%s1625_s7 + $0x10] sm:$0xff] }
   0x6   :  { %1031 = vmatpush1.msk.msra.mxu1 %vm53_vm0, %v1026_v1  ;;  %1029 = vmatmul.mubr.msk.f32.vlgmr.msra.gmra.mxu0 %vm49_vm1, %v42_v8  ;;  %v793_v62 = vld [vmem:[%s1625_s7] sm:$0xff]  ;;  %v580_v1 = vld [vmem:[%s1624_s6 + $0x10] sm:$0xff] }
   0x7   :  { %1032 = vmatmul.mubr.msk.f32.vlgmr.msra.gmra.mxu1 %vm49_vm1, %v42_v8  ;;  %679 = vmatprep.mubr.f32.mxu0 %v1077_v2  ;;  %v578_v0 = vld [vmem:[%s1624_s6] sm:$0xff] }
   0x8   :  { %768 = vmatprep.mubr.f32.mxu1 %v1077_v2  ;;  %v797_v5 = vld [vmem:[%s1626_s8] sm:$0xff] }
  0x7e   :  { %v47_v9 = vpop.permute.xlu0 %46 }
  0x7f   :  { %v239_v29 = vpop.permute.xlu1 %238 }
  0xc6   :  { %v128_v10 = vpop.f32.mrf.mxu0 }
  0xc7   :  { %v199_v11 = vpop.f32.mrf.mxu1  ;;  %v129_v12 = vadd.f32 %v128_v10, %v47_v9  ;;  %v1034_v10 = vld [vmem:[%s1627_s9 + $0x28] ss:$0 sm:$0xff] }
  0xc8   :  { %v130_v13 = vpop.f32.mrf.mxu0  ;;  %v200_v15 = vadd.f32 %v199_v11, %v47_v9 }
  0xc9   :  { %v201_v14 = vpop.f32.mrf.mxu1  ;;  %v131_v16 = vadd.f32 %v130_v13, %v47_v9  ;;  %v213_v17 = vmul.f32 %v129_v12, %v129_v12 }
  0xca   :  { %v202_v20 = vadd.f32 %v201_v14, %v47_v9  ;;  %v215_v21 = vmul.f32 %v200_v15, %v200_v15  ;;  %v1247_v9 = vshrl.u32 %v288_v6, 7 }
  0xcb   :  { %v206_v18 = vadd.f32 %v131_v16, %v129_v12  ;;  %v214_v19 = vmul.f32 %v131_v16, %v131_v16 }
  0xcc   :  { %v216_v25 = vmul.f32 %v202_v20, %v202_v20 }
  0xcd   :  { %v207_v22 = vadd.f32 %v206_v18, %v200_v15  ;;  %v217_v23 = vadd.f32 %v214_v19, %v213_v17  ;;  %v1264_v17 = vld [vmem:[%s1627_s9 + $0x8] sm:$0xff] }
  0xcf   :  { %v208_v24 = vadd.f32 %v207_v22, %v202_v20  ;;  %v218_v26 = vadd.f32 %v217_v23, %v215_v21  ;;  %v1274_v23 = vld [vmem:[%s1627_s9] sm:$0xff] }
  0xd1   :  { %209 = vadd.xlane.f32.xlu0 %v208_v24  ;;  %v219_v27 = vadd.f32 %v218_v26, %v216_v25 }
  0xd3   :  { %220 = vadd.xlane.f32.xlu1 %v219_v27 }
  0xe4   :  { %247 = vperm.xlu1 %1064, %v205_v28  }
 0x15a   :  { %v210_v30 = vpop.xlane.xlu0 %209 }
 0x15b   :  { %v212_v31 = vmul.f32 0.001953125, %v210_v30 }
 0x15c   :  { %v221_v32 = vpop.xlane.xlu1 %220 }
 0x15d   :  { %v222_v33 = vmul.f32 0.001953125, %v221_v32  ;;  %v223_v34 = vmul.f32 %v212_v31, %v212_v31  ;;  %v226_v38 = vsub.f32 %v129_v12, %v212_v31  ;;  %v227_v39 = vsub.f32 %v131_v16, %v212_v31  ;;  %v1033_v16 = vld [vmem:[%s1627_s9 + $0x20] ss:$0 sm:$0xff] }
 0x15e   :  { %v228_v40 = vsub.f32 %v200_v15, %v212_v31  ;;  %v229_v55 = vsub.f32 %v202_v20, %v212_v31  ;;  %v1256_v15 = vsub.s32 7, %v1247_v9  ;;  %v1281_v32 = vsub.s32 6, %v1247_v9 }
 0x15f   :  { %v224_v35 = vsub.f32 %v222_v33, %v223_v34 }
 0x160   :  { %v248_v48 = vpop.permute.xlu1 %247  ;;  %v523_v22 = vrot.slane %v1264_v17, %v1256_v15  ;;  %v519_v27 = vrot.slane %v1274_v23, %v1256_v15 }
 0x161   :  { %v225_v36 = vmax.f32 %v224_v35, 0.0  ;;  %v485_v35 = vrot.slane %v1264_v17, %v1281_v32 }
 0x163   :  { %v230_v37 = vadd.f32 1e-05, %v225_v36  ;;  %v481_v36 = vrot.slane %v1274_v23, %v1281_v32 }
 0x165   :  { %1067 = vrsqrt.f32 %v230_v37 }
 0x172   :  { %v1068_v41 = vpop.eup %1067 }
 0x173   :  { %v232_v42 = vmul.f32 %v1068_v41, %v226_v38  ;;  %v233_v43 = vmul.f32 %v1068_v41, %v227_v39  ;;  %v234_v44 = vmul.f32 %v1068_v41, %v228_v40  ;;  %v235_v56 = vmul.f32 %v1068_v41, %v229_v55 }
 0x175   :  { %v241_v45 = vmul.f32 %v239_v29, %v232_v42  ;;  %v242_v46 = vmul.f32 %v239_v29, %v233_v43  ;;  %v243_v47 = vmul.f32 %v239_v29, %v234_v44  ;;  %v244_v57 = vmul.f32 %v239_v29, %v235_v56  ;;  %v1035_v42 = vld [vmem:[%s1627_s9 + $0x30] ss:$0 sm:$0xff]  ;;  %v1036_v43 = vld [vmem:[%s1627_s9 + $0x38] ss:$0 sm:$0xff] }
 0x176   :  { %v442_v44 = vsub.s32 5, %v1247_v9 }
 0x177   :  { %v251_v49 = vadd.f32 %v248_v48, %v242_v46  ;;  %v250_v50 = vadd.f32 %v248_v48, %v241_v45  ;;  %v252_v51 = vadd.f32 %v248_v48, %v243_v47  ;;  %v253_v58 = vadd.f32 %v248_v48, %v244_v57  ;;  %v1306_v57 = vld [vmem:[%s1627_s9 + $0x10] sm:$0xff] }
 0x178   :  { %v447_v55 = vrot.slane %v1264_v17, %v442_v44 }
 0x179   :  { %v1168_v52 = vmax.f32 %v251_v49, 0.0  ;;  %v1173_v53 = vmax.f32 %v250_v50, 0.0  ;;  %v1175_v54 = vmax.f32 %v252_v51, 0.0  ;;  %v1188_v59 = vmax.f32 %v253_v58, 0.0  ;;  %v1311_v58 = vld [vmem:[%s1627_s9 + $0x18] sm:$0xff] }
 0x17a   :  { %v443_v51 = vrot.slane %v1274_v23, %v442_v44 }
 0x17b   :  { %500 = vrot.lane.b32.xlu0 %v1168_v52, %s1079_s3  ;;  %538 = vrot.lane.b32.xlu1 %v1168_v52, %s1080_s4 }
 0x17f   :  { %540 = vrot.lane.b32.xlu1 %v1175_v54, %s1080_s4  ;;  %460 = vrot.lane.b32.xlu0 %v1173_v53, %s1081_s22 }
 0x183   :  { %426 = vrot.lane.b32.xlu0 %v1175_v54, %s1082_s23  ;;  %536 = vrot.lane.b32.xlu1 %v1173_v53, %s1080_s4 }
 0x187   :  { %422 = vrot.lane.b32.xlu0 %v1173_v53, %s1082_s23  ;;  %502 = vrot.lane.b32.xlu1 %v1175_v54, %s1079_s3 }
 0x18b   :  { %387 = vrot.lane.b32.xlu0 %v1173_v53, %s1083_s24  ;;  %498 = vrot.lane.b32.xlu1 %v1173_v53, %s1079_s3 }
 0x18f   :  { %428 = vrot.lane.b32.xlu0 %v1188_v59, %s1082_s23  ;;  %462 = vrot.lane.b32.xlu1 %v1168_v52, %s1081_s22 }
 0x193   :  { %349 = vrot.lane.b32.xlu0 %v1173_v53, %s1084_s25  ;;  %464 = vrot.lane.b32.xlu1 %v1175_v54, %s1081_s22 }
 0x197   :  { %346 = vrot.lane.b32.xlu0 %v1188_v59, %s1084_s25  ;;  %542 = vrot.lane.b32.xlu1 %v1188_v59, %s1080_s4 }
 0x19b   :  { %313 = vrot.lane.b32.xlu0 %v1168_v52, %s1085_s26  ;;  %424 = vrot.lane.b32.xlu1 %v1168_v52, %s1082_s23 }
 0x19f   :  { %308 = vrot.lane.b32.xlu0 %v1188_v59, %s1085_s26  ;;  %504 = vrot.lane.b32.xlu1 %v1188_v59, %s1079_s3 }
 0x1a3   :  { %275 = vrot.lane.b32.xlu0 %v1168_v52, %s1086_s27  ;;  %466 = vrot.lane.b32.xlu1 %v1188_v59, %s1081_s22 }
 0x1a7   :  { %267 = vrot.lane.b32.xlu0 %v1188_v59, %s1086_s27  ;;  %389 = vrot.lane.b32.xlu1 %v1168_v52, %s1083_s24 }
 0x1ab   :  { %277 = vrot.lane.b32.xlu0 %v1175_v54, %s1086_s27  ;;  %384 = vrot.lane.b32.xlu1 %v1188_v59, %s1083_s24 }
 0x1af   :  { %589 = vperm.xlu0 %1063, %v579_v60   ;;  %351 = vrot.lane.b32.xlu1 %v1168_v52, %s1084_s25 }
 0x1b3   :  { %599 = vperm.xlu0 %1063, %v581_v61   ;;  %311 = vrot.lane.b32.xlu1 %v1173_v53, %s1085_s26 }
 0x1b7   :  { %919 = vperm.xlu0 %1063, %v793_v62   ;;  %391 = vrot.lane.b32.xlu1 %v1175_v54, %s1083_s24 }
 0x1bb   :  { %934 = vperm.xlu0 %1063, %v796_v63   ;;  %273 = vrot.lane.b32.xlu1 %v1173_v53, %s1086_s27 }
 0x1bf   :  { %353 = vrot.lane.b32.xlu1 %v1175_v54, %s1084_s25 }
 0x1c3   :  { %315 = vrot.lane.b32.xlu1 %v1175_v54, %s1085_s26 }
 0x1c7   :  { %584 = vperm.xlu1 %1064, %v578_v0  }
 0x1cb   :  { %594 = vperm.xlu1 %1064, %v580_v1   ;;  %v527_v1 = vrot.slane %v1306_v57, %v1256_v15 }
 0x1cf   :  { %924 = vperm.xlu1 %1064, %v794_v3   ;;  %v531_v3 = vrot.slane %v1311_v58, %v1256_v15  ;;  %v455_v15 = vrot.slane %v1311_v58, %v442_v44 }
 0x1d3   :  { %929 = vperm.xlu1 %1064, %v795_v4  }
 0x1d7   :  { %955 = vperm.xlu1 %1064, %v797_v5  }
 0x1ed   :  { %v501_v7 = vpop.permute.xlu0 %500  ;;  %v539_v8 = vpop.permute.xlu1 %538 }
 0x1f1   :  { %v541_v11 = vpop.permute.xlu1 %540  ;;  %v1252_v12 = vpop.permute.xlu0 %460 }
 0x1f2   :  { %v546_v13 = vsel %vm544_vm2, %v539_v8, %v541_v11 }
 0x1f3   :  { %v571_v14 = vmul.f32 %v1034_v10, %v546_v13  ;;  %v1328_v13 = vsub.s32 3, %v1247_v9 }
 0x1f5   :  { %629 = vmatprep.subr.mxu0 %v571_v14  ;;  %v537_v18 = vpop.permute.xlu1 %536  ;;  %v1267_v20 = vpop.permute.xlu0 %426  ;;  %v451_v14 = vrot.slane %v1306_v57, %v442_v44 }
 0x1f6   :  { %v545_v19 = vsel %vm544_vm2, %v537_v18, %v539_v8 }
 0x1f7   :  { %v570_v21 = vmul.f32 %v1033_v16, %v545_v19 }
 0x1f9   :  { %630 = vmatpush1.msra.mxu0 %v570_v21  ;;  %v503_v24 = vpop.permute.xlu1 %502  ;;  %v423_v28 = vpop.permute.xlu0 %422 }
 0x1fa   :  { %v508_v25 = vsel %vm506_vm3, %v501_v7, %v503_v24 }
 0x1fb   :  { %v533_v26 = vmul.f32 %v523_v22, %v508_v25  ;;  %v409_v25 = vrot.slane %v1264_v17, %v1328_v13 }
 0x1fd   :  { %631 = vmatprep.subr.mxu0 %v533_v26  ;;  %v499_v29 = vpop.permute.xlu1 %498  ;;  %v1283_v34 = vpop.permute.xlu0 %387 }
 0x1fe   :  { %v507_v30 = vsel %vm506_vm3, %v499_v29, %v501_v7  ;;  %v489_v7 = vrot.slane %v1306_v57, %v1281_v32 }
 0x1ff   :  { %v532_v31 = vmul.f32 %v519_v27, %v507_v30 }
 0x201   :  { %632 = vmatpush1.msra.mxu0 %v532_v31  ;;  %v463_v33 = vpop.permute.xlu1 %462  ;;  %v429_v45 = vpop.permute.xlu0 %428  ;;  %v1350_v31 = vsub.s32 2, %v1247_v9 }
 0x202   :  { %v469_v37 = vsel %vm468_vm4, %v1252_v12, %v463_v33  ;;  %v439_v19 = vsel %vm430_vm5, %v429_v45, %v423_v28 }
 0x203   :  { %v494_v41 = vmul.f32 %v481_v36, %v469_v37  ;;  %v459_v26 = vmul.f32 %v455_v15, %v439_v19  ;;  %v371_v36 = vrot.slane %v1264_v17, %v1350_v31  ;;  %v1359_v37 = vsub.s32 1, %v1247_v9 }
 0x205   :  { %v465_v38 = vpop.permute.xlu1 %464  ;;  %v350_v62 = vpop.permute.xlu0 %349  ;;  %v337_v19 = vrot.slane %v1306_v57, %v1359_v37 }
 0x206   :  { %v470_v39 = vsel %vm468_vm4, %v463_v33, %v465_v38 }
 0x207   :  { %v495_v40 = vmul.f32 %v485_v35, %v470_v39 }
 0x209   :  { %633 = vmatprep.subr.mxu0 %v495_v40  ;;  %v543_v46 = vpop.permute.xlu1 %542  ;;  %v1333_v16 = vpop.permute.xlu0 %346 }
 0x20a   :  { %v547_v47 = vsel %vm544_vm2, %v541_v11, %v543_v46  ;;  %v553_v48 = vsel %vm544_vm2, %v543_v46, %v537_v18  ;;  %634 = vmatpush1.msra.mxu0 %v494_v41  ;;  %v493_v11 = vrot.slane %v1311_v58, %v1281_v32  ;;  %v329_v41 = vrot.slane %v1274_v23, %v1359_v37 }
 0x20b   :  { %v572_v49 = vmul.f32 %v1035_v42, %v547_v47  ;;  %v573_v50 = vmul.f32 %v1036_v43, %v553_v48  ;;  %v333_v42 = vrot.slane %v1264_v17, %v1359_v37 }
 0x20d   :  { %718 = vmatprep.subr.mxu1 %v573_v50  ;;  %v425_v56 = vpop.permute.xlu1 %424  ;;  %v1345_v30 = vpop.permute.xlu0 %313  ;;  %v413_v50 = vrot.slane %v1306_v57, %v1328_v13 }
 0x20e   :  { %v431_v60 = vsel %vm430_vm5, %v423_v28, %v425_v56  ;;  %v432_v61 = vsel %vm430_vm5, %v425_v56, %v1267_v20  ;;  %719 = vmatpush1.msra.mxu1 %v572_v49 }
 0x20f   :  { %v456_v63 = vmul.f32 %v443_v51, %v431_v60  ;;  %v457_v0 = vmul.f32 %v447_v55, %v432_v61  ;;  %v417_v51 = vrot.slane %v1311_v58, %v1328_v13  ;;  %v290_v55 = vsub.s32 0, %v1247_v9 }
 0x211   :  { %635 = vmatprep.subr.mxu0 %v457_v0  ;;  %v505_v4 = vpop.permute.xlu1 %504  ;;  %v1365_v39 = vpop.permute.xlu0 %308  ;;  %v291_v0 = vrot.slane %v1274_v23, %v290_v55 }
 0x212   :  { %v509_v5 = vsel %vm506_vm3, %v503_v24, %v505_v4  ;;  %v515_v6 = vsel %vm506_vm3, %v505_v4, %v499_v29  ;;  %636 = vmatpush1.msra.mxu0 %v456_v63 }
 0x213   :  { %v534_v8 = vmul.f32 %v527_v1, %v509_v5  ;;  %v535_v10 = vmul.f32 %v531_v3, %v515_v6  ;;  %637 = vmatprep.subr.mxu0 %v1168_v52  ;;  %v295_v1 = vrot.slane %v1264_v17, %v290_v55  ;;  %v574_v17 = vld [vmem:[%s1628_s5] sm:$0xff] }
 0x214   :  { %638 = vmatpush1.msra.mxu0 %v1173_v53  ;;  %v433_v53 = vsel %vm430_vm5, %v1267_v20, %v429_v45  ;;  %v405_v20 = vrot.slane %v1274_v23, %v1328_v13 }
 0x215   :  { %720 = vmatprep.subr.mxu1 %v535_v10  ;;  %v467_v18 = vpop.permute.xlu1 %466  ;;  %v458_v29 = vmul.f32 %v451_v14, %v433_v53  ;;  %v276_v47 = vpop.permute.xlu0 %275  ;;  %v379_v10 = vrot.slane %v1311_v58, %v1350_v31 }
 0x216   :  { %v471_v52 = vsel %vm468_vm4, %v465_v38, %v467_v18  ;;  %v477_v21 = vsel %vm468_vm4, %v467_v18, %v1252_v12  ;;  %721 = vmatpush1.msra.mxu1 %v534_v8  ;;  %v367_v38 = vrot.slane %v1274_v23, %v1350_v31  ;;  %v375_v8 = vrot.slane %v1306_v57, %v1350_v31 }
 0x217   :  { %v496_v22 = vmul.f32 %v489_v7, %v471_v52  ;;  %v497_v24 = vmul.f32 %v493_v11, %v477_v21  ;;  %v341_v52 = vrot.slane %v1311_v58, %v1359_v37  ;;  %v575_v21 = vld [vmem:[%s1628_s5 + $0x8] sm:$0xff] }
 0x219   :  { %722 = vmatprep.subr.mxu1 %v497_v24  ;;  %v390_v27 = vpop.permute.xlu1 %389  ;;  %v268_v3 = vpop.permute.xlu0 %267 }
 0x21a   :  { %v394_v28 = vsel %vm393_vm6, %v1283_v34, %v390_v27  ;;  %723 = vmatpush1.msra.mxu1 %v496_v22  ;;  %v299_v22 = vrot.slane %v1306_v57, %v290_v55  ;;  %v576_v57 = vld [vmem:[%s1628_s5 + $0x10] sm:$0xff] }
 0x21b   :  { %v419_v12 = vmul.f32 %v409_v25, %v394_v28  ;;  %724 = vmatprep.subr.mxu1 %v459_v26 }
 0x21c   :  { %725 = vmatpush1.msra.mxu1 %v458_v29 }
 0x21d   :  { %639 = vmatprep.subr.mxu0 %v419_v12  ;;  %726 = vmatprep.subr.mxu1 %v1188_v59  ;;  %v385_v32 = vpop.permute.xlu1 %384  ;;  %v363_v59 = vsel %vm355_vm7, %v1333_v16, %v350_v62  ;;  %v278_v14 = vpop.permute.xlu0 %277 }
 0x21e   :  { %v401_v33 = vsel %vm393_vm6, %v385_v32, %v1283_v34  ;;  %727 = vmatpush1.msra.mxu1 %v1175_v54  ;;  %v380_v43 = vmul.f32 %v367_v38, %v363_v59  ;;  %v282_v24 = vsel %vm279_vm9, %v278_v14, %v268_v3 }
 0x21f   :  { %v418_v35 = vmul.f32 %v405_v20, %v401_v33 }
 0x221   :  { %640 = vmatpush1.msra.mxu0 %v418_v35  ;;  %v352_v40 = vpop.permute.xlu1 %351 }
 0x222   :  { %v356_v34 = vsel %vm355_vm7, %v350_v62, %v352_v40 }
 0x223   :  { %v381_v54 = vmul.f32 %v371_v36, %v356_v34 }
 0x225   :  { %641 = vmatprep.subr.mxu0 %v381_v54  ;;  %v312_v44 = vpop.permute.xlu1 %311 }
 0x226   :  { %v318_v45 = vsel %vm317_vm8, %v312_v44, %v1345_v30  ;;  %v325_v46 = vsel %vm317_vm8, %v1365_v39, %v312_v44  ;;  %642 = vmatpush1.msra.mxu0 %v380_v43 }
 0x227   :  { %v342_v48 = vmul.f32 %v329_v41, %v325_v46  ;;  %v343_v49 = vmul.f32 %v333_v42, %v318_v45 }
 0x229   :  { %643 = vmatprep.subr.mxu0 %v343_v49  ;;  %v392_v56 = vpop.permute.xlu1 %391 }
 0x22a   :  { %v395_v60 = vsel %vm393_vm6, %v390_v27, %v392_v56  ;;  %v396_v61 = vsel %vm393_vm6, %v392_v56, %v385_v32  ;;  %644 = vmatpush1.msra.mxu0 %v342_v48  ;;  %v281_v27 = vsel %vm279_vm9, %v276_v47, %v278_v14  ;;  %v590_v38 = vpop.permute.xlu0 %589 }
 0x22b   :  { %v420_v62 = vmul.f32 %v413_v50, %v395_v60  ;;  %v421_v63 = vmul.f32 %v417_v51, %v396_v61  ;;  %v306_v12 = vmul.f32 %v299_v22, %v281_v27 }
 0x22d   :  { %728 = vmatprep.subr.mxu1 %v421_v63  ;;  %v274_v4 = vpop.permute.xlu1 %273 }
 0x22e   :  { %v280_v5 = vsel %vm279_vm9, %v274_v4, %v276_v47  ;;  %v287_v9 = vsel %vm279_vm9, %v268_v3, %v274_v4  ;;  %729 = vmatpush1.msra.mxu1 %v420_v62 }
 0x22f   :  { %v304_v6 = vmul.f32 %v291_v0, %v287_v9  ;;  %v305_v7 = vmul.f32 %v295_v1, %v280_v5  ;;  %v600_v0 = vpop.permute.xlu0 %599 }
 0x231   :  { %645 = vmatprep.subr.mxu0 %v305_v7  ;;  %v354_v23 = vpop.permute.xlu1 %353 }
 0x232   :  { %v357_v11 = vsel %vm355_vm7, %v352_v40, %v354_v23  ;;  %v358_v13 = vsel %vm355_vm7, %v354_v23, %v1333_v16  ;;  %646 = vmatpush1.msra.mxu0 %v304_v6  ;;  %v303_v16 = vrot.slane %v1311_v58, %v290_v55 }
 0x233   :  { %v382_v15 = vmul.f32 %v375_v8, %v357_v11  ;;  %v383_v18 = vmul.f32 %v379_v10, %v358_v13  ;;  %1037 = vmatmul.mubr.msk.f32.vlgmr.msra.gmra.mxu0 %vm602_vm10, %v574_v17 }
 0x234   :  { %685 = vmatprep.mubr.f32.mxu0 %v1077_v2  ;;  %v307_v58 = vmul.f32 %v303_v16, %v282_v24 }
 0x235   :  { %730 = vmatprep.subr.mxu1 %v383_v18  ;;  %v316_v53 = vpop.permute.xlu1 %315 }
 0x236   :  { %v319_v25 = vsel %vm317_vm8, %v1345_v30, %v316_v53  ;;  %v320_v26 = vsel %vm317_vm8, %v316_v53, %v1365_v39  ;;  %731 = vmatpush1.msra.mxu1 %v382_v15  ;;  %v577_v30 = vld [vmem:[%s1628_s5 + $0x18] sm:$0xff] }
 0x237   :  { %v344_v29 = vmul.f32 %v337_v19, %v319_v25  ;;  %v345_v28 = vmul.f32 %v341_v52, %v320_v26  ;;  %1038 = vmatmul.mubr.msk.f32.gmra.mxu0 %vm602_vm10, %v575_v21 }
 0x238   :  { %691 = vmatprep.mubr.f32.mxu0 %v1077_v2 }
 0x239   :  { %732 = vmatprep.subr.mxu1 %v345_v28 }
 0x23a   :  { %733 = vmatpush1.msra.mxu1 %v344_v29 }
 0x23b   :  { %1039 = vmatmul.mubr.msk.f32.gmra.mxu0 %vm602_vm10, %v576_v57  ;;  %734 = vmatprep.subr.mxu1 %v307_v58 }
 0x23c   :  { %735 = vmatpush1.msra.mxu1 %v306_v12  ;;  %697 = vmatprep.mubr.f32.mxu0 %v1077_v2 }
 0x23d   :  { %1041 = vmatmul.mubr.msk.f32.vlgmr.msra.gmra.mxu1 %vm602_vm10, %v574_v17 }
 0x23e   :  { %774 = vmatprep.mubr.f32.mxu1 %v1077_v2 }
 0x23f   :  { %1040 = vmatmul.mubr.msk.f32.gmra.mxu0 %vm602_vm10, %v577_v30 }
 0x241   :  { %1042 = vmatmul.mubr.msk.f32.gmra.mxu1 %vm602_vm10, %v575_v21 }
 0x242   :  { %780 = vmatprep.mubr.f32.mxu1 %v1077_v2  ;;  %v585_v32 = vpop.permute.xlu1 %584 }
 0x245   :  { %1043 = vmatmul.mubr.msk.f32.gmra.mxu1 %vm602_vm10, %v576_v57 }
 0x246   :  { %786 = vmatprep.mubr.f32.mxu1 %v1077_v2  ;;  %v595_v56 = vpop.permute.xlu1 %594 }
 0x249   :  { %1044 = vmatmul.mubr.msk.f32.gmra.mxu1 %vm602_vm10, %v577_v30 }
 0x2f3   :  { %v681_v20 = vpop.f32.mrf.mxu0 }
 0x2f4   :  { %v1434_v37 = vadd.f32 %v681_v20, %v585_v32 }
 0x2f5   :  { %v683_v31 = vpop.f32.mrf.mxu0 }
 0x2f6   :  { %v1432_v35 = vadd.f32 %v683_v31, %v585_v32  ;;  %v825_v54 = vmul.f32 %v1434_v37, %v1434_v37 }
 0x2f7   :  { %v687_v33 = vpop.f32.mrf.mxu0 }
 0x2f8   :  { %v826_v39 = vmul.f32 %v1432_v35, %v1432_v35  ;;  %v1442_v41 = vadd.f32 %v687_v33, %v590_v38  ;;  %v801_v43 = vadd.f32 %v1432_v35, %v1434_v37 }
 0x2f9   :  { %v689_v36 = vpop.f32.mrf.mxu0 }
 0x2fa   :  { %v1438_v40 = vadd.f32 %v689_v36, %v590_v38  ;;  %v841_v48 = vadd.f32 %v826_v39, %v825_v54  ;;  %v829_v60 = vmul.f32 %v1442_v41, %v1442_v41 }
 0x2fb   :  { %v693_v59 = vpop.f32.mrf.mxu0 }
 0x2fc   :  { %v830_v46 = vmul.f32 %v1438_v40, %v1438_v40  ;;  %v806_v61 = vadd.f32 %v1438_v40, %v1442_v41  ;;  %v1461_v1 = vadd.f32 %v693_v59, %v595_v56 }
 0x2fd   :  { %v695_v34 = vpop.f32.mrf.mxu0  ;;  %v770_v2 = vpop.f32.mrf.mxu1 }
 0x2fe   :  { %v1444_v42 = vadd.f32 %v770_v2, %v585_v32  ;;  %v1463_v3 = vadd.f32 %v695_v34, %v595_v56  ;;  %v846_v10 = vadd.f32 %v830_v46, %v829_v60  ;;  %v833_v16 = vmul.f32 %v1461_v1, %v1461_v1  ;;  %v800_v46 = vld [vmem:[%s1626_s8 + $0x18] sm:$0xff] }
 0x2ff   :  { %v699_v44 = vpop.f32.mrf.mxu0  ;;  %v772_v45 = vpop.f32.mrf.mxu1 }
 0x300   :  { %v827_v47 = vmul.f32 %v1444_v42, %v1444_v42  ;;  %v1452_v49 = vadd.f32 %v772_v45, %v585_v32  ;;  %v802_v55 = vadd.f32 %v801_v43, %v1444_v42  ;;  %v1475_v13 = vadd.f32 %v699_v44, %v600_v0  ;;  %v799_v44 = vld [vmem:[%s1626_s8 + $0x10] sm:$0xff]  ;;  %v798_v45 = vld [vmem:[%s1626_s8 + $0x8] sm:$0xff] }
 0x301   :  { %v701_v50 = vpop.f32.mrf.mxu0  ;;  %v776_v51 = vpop.f32.mrf.mxu1  ;;  %v811_v19 = vadd.f32 %v1463_v3, %v1461_v1  ;;  %v834_v52 = vmul.f32 %v1463_v3, %v1463_v3 }
 0x302   :  { %v1459_v62 = vadd.f32 %v776_v51, %v590_v38  ;;  %v842_v63 = vadd.f32 %v841_v48, %v827_v47  ;;  %v803_v5 = vadd.f32 %v802_v55, %v1452_v49  ;;  %v828_v9 = vmul.f32 %v1452_v49, %v1452_v49  ;;  %v1521_v47 = vpop.permute.xlu1 %924 }
 0x303   :  { %v778_v4 = vpop.f32.mrf.mxu1  ;;  %v1468_v6 = vadd.f32 %v701_v50, %v600_v0  ;;  %v837_v28 = vmul.f32 %v1475_v13, %v1475_v13  ;;  %v851_v30 = vadd.f32 %v834_v52, %v833_v16  ;;  %v920_v50 = vpop.permute.xlu0 %919 }
 0x304   :  { %v831_v7 = vmul.f32 %v1459_v62, %v1459_v62  ;;  %v1472_v8 = vadd.f32 %v778_v4, %v590_v38  ;;  %804 = vadd.xlane.f32.xlu1 %v803_v5  ;;  %v843_v23 = vadd.f32 %v842_v63, %v828_v9  ;;  %v807_v11 = vadd.f32 %v806_v61, %v1459_v62 }
 0x305   :  { %v782_v17 = vpop.f32.mrf.mxu1  ;;  %v838_v53 = vmul.f32 %v1468_v6, %v1468_v6  ;;  %v816_v57 = vadd.f32 %v1468_v6, %v1475_v13 }
 0x306   :  { %v1477_v14 = vadd.f32 %v782_v17, %v595_v56  ;;  %v832_v15 = vmul.f32 %v1472_v8, %v1472_v8  ;;  %v847_v18 = vadd.f32 %v846_v10, %v831_v7  ;;  %844 = vadd.xlane.f32.xlu0 %v843_v23  ;;  %v808_v27 = vadd.f32 %v807_v11, %v1472_v8  ;;  %v1523_v48 = vpop.permute.xlu1 %929 }
 0x307   :  { %v784_v21 = vpop.f32.mrf.mxu1  ;;  %v856_v33 = vadd.f32 %v838_v53, %v837_v28  ;;  %v1525_v55 = vpop.permute.xlu0 %934 }
 0x308   :  { %v848_v22 = vadd.f32 %v847_v18, %v832_v15  ;;  %v835_v24 = vmul.f32 %v1477_v14, %v1477_v14  ;;  %v1491_v25 = vadd.f32 %v784_v21, %v595_v56  ;;  %v812_v29 = vadd.f32 %v811_v19, %v1477_v14 }
 0x309   :  { %v788_v26 = vpop.f32.mrf.mxu1 }
 0x30a   :  { %v1499_v58 = vadd.f32 %v788_v26, %v600_v0  ;;  %849 = vadd.xlane.f32.xlu1 %v848_v22  ;;  %809 = vadd.xlane.f32.xlu0 %v808_v27  ;;  %v813_v36 = vadd.f32 %v812_v29, %v1491_v25  ;;  %v836_v38 = vmul.f32 %v1491_v25, %v1491_v25  ;;  %v956_v51 = vpop.permute.xlu1 %955 }
 0x30b   :  { %v790_v12 = vpop.f32.mrf.mxu1  ;;  %v852_v59 = vadd.f32 %v851_v30, %v835_v24 }
 0x30c   :  { %v839_v20 = vmul.f32 %v1499_v58, %v1499_v58  ;;  %v1503_v31 = vadd.f32 %v790_v12, %v600_v0  ;;  %v817_v32 = vadd.f32 %v816_v57, %v1499_v58 }
 0x30d   :  { %v853_v54 = vadd.f32 %v852_v59, %v836_v38 }
 0x30e   :  { %v818_v39 = vadd.f32 %v817_v32, %v1503_v31  ;;  %v840_v34 = vmul.f32 %v1503_v31, %v1503_v31  ;;  %v857_v2 = vadd.f32 %v856_v33, %v839_v20  ;;  %814 = vadd.xlane.f32.xlu0 %v813_v36 }
 0x310   :  { %819 = vadd.xlane.f32.xlu1 %v818_v39  ;;  %v858_v43 = vadd.f32 %v857_v2, %v840_v34 }
 0x312   :  { %854 = vadd.xlane.f32.xlu0 %v853_v54 }
 0x314   :  { %859 = vadd.xlane.f32.xlu1 %v858_v43 }
 0x325   :  { %965 = vperm.xlu1 %1064, %v799_v44  }
 0x328   :  { %960 = vperm.xlu0 %1063, %v798_v45  }
 0x32c   :  { %970 = vperm.xlu0 %1063, %v800_v46  }
 0x38d   :  { %v805_v56 = vpop.xlane.xlu1 %804 }
 0x38e   :  { %v821_v60 = vmul.f32 0.001953125, %v805_v56 }
 0x38f   :  { %v845_v61 = vpop.xlane.xlu0 %844 }
 0x390   :  { %v861_v63 = vmul.f32 0.001953125, %v845_v61  ;;  %v865_v0 = vmul.f32 %v821_v60, %v821_v60  ;;  %v877_v36 = vsub.f32 %v1434_v37, %v821_v60  ;;  %v878_v38 = vsub.f32 %v1432_v35, %v821_v60 }
 0x391   :  { %v879_v59 = vsub.f32 %v1444_v42, %v821_v60  ;;  %v880_v39 = vsub.f32 %v1452_v49, %v821_v60 }
 0x392   :  { %v869_v4 = vsub.f32 %v861_v63, %v865_v0 }
 0x393   :  { %v810_v5 = vpop.xlane.xlu0 %809  ;;  %v850_v9 = vpop.xlane.xlu1 %849 }
 0x394   :  { %v822_v7 = vmul.f32 0.001953125, %v810_v5  ;;  %v873_v10 = vmax.f32 %v869_v4, 0.0  ;;  %v862_v23 = vmul.f32 0.001953125, %v850_v9 }
 0x396   :  { %v866_v17 = vmul.f32 %v822_v7, %v822_v7  ;;  %v893_v11 = vadd.f32 1e-05, %v873_v10  ;;  %v881_v63 = vsub.f32 %v1442_v41, %v822_v7  ;;  %v882_v37 = vsub.f32 %v1438_v40, %v822_v7 }
 0x397   :  { %v815_v15 = vpop.xlane.xlu0 %814  ;;  %v883_v35 = vsub.f32 %v1459_v62, %v822_v7  ;;  %v884_v42 = vsub.f32 %v1472_v8, %v822_v7 }
 0x398   :  { %v870_v18 = vsub.f32 %v862_v23, %v866_v17  ;;  %v1527_v19 = vmul.f32 0.001953125, %v815_v15  ;;  %1069 = vrsqrt.f32 %v893_v11 }
 0x399   :  { %v820_v52 = vpop.xlane.xlu1 %819 }
 0x39a   :  { %v1529_v21 = vmul.f32 0.001953125, %v820_v52  ;;  %v874_v16 = vmax.f32 %v870_v18, 0.0  ;;  %v867_v24 = vmul.f32 %v1527_v19, %v1527_v19  ;;  %v887_v7 = vsub.f32 %v1477_v14, %v1527_v19 }
 0x39b   :  { %v855_v53 = vpop.xlane.xlu0 %854  ;;  %v888_v52 = vsub.f32 %v1491_v25, %v1527_v19 }
 0x39c   :  { %v894_v22 = vadd.f32 1e-05, %v874_v16  ;;  %v863_v26 = vmul.f32 0.001953125, %v855_v53  ;;  %v868_v29 = vmul.f32 %v1529_v21, %v1529_v21  ;;  %v892_v14 = vsub.f32 %v1503_v31, %v1529_v21 }
 0x39d   :  { %v860_v27 = vpop.xlane.xlu1 %859 }
 0x39e   :  { %v864_v28 = vmul.f32 0.001953125, %v860_v27  ;;  %1071 = vrsqrt.f32 %v894_v22  ;;  %v871_v57 = vsub.f32 %v863_v26, %v867_v24 }
 0x3a0   :  { %v872_v12 = vsub.f32 %v864_v28, %v868_v29  ;;  %v875_v30 = vmax.f32 %v871_v57, 0.0  ;;  %v889_v29 = vsub.f32 %v1475_v13, %v1529_v21 }
 0x3a2   :  { %v876_v20 = vmax.f32 %v872_v12, 0.0  ;;  %v895_v32 = vadd.f32 1e-05, %v875_v30 }
 0x3a3   :  { %v961_v16 = vpop.permute.xlu0 %960 }
 0x3a4   :  { %v896_v33 = vadd.f32 1e-05, %v876_v20  ;;  %1073 = vrsqrt.f32 %v895_v32 }
 0x3a5   :  { %v1070_v34 = vpop.eup %1069 }
 0x3a6   :  { %1075 = vrsqrt.f32 %v896_v33  ;;  %v901_v2 = vmul.f32 %v1070_v34, %v877_v36  ;;  %v902_v54 = vmul.f32 %v1070_v34, %v878_v38  ;;  %v903_v43 = vmul.f32 %v1070_v34, %v879_v59  ;;  %v966_v38 = vpop.permute.xlu1 %965 }
 0x3a7   :  { %v904_v44 = vmul.f32 %v1070_v34, %v880_v39 }
 0x3a8   :  { %v937_v45 = vmul.f32 %v920_v50, %v901_v2  ;;  %v938_v46 = vmul.f32 %v920_v50, %v902_v54  ;;  %v939_v56 = vmul.f32 %v920_v50, %v903_v43 }
 0x3a9   :  { %v940_v61 = vmul.f32 %v920_v50, %v904_v44 }
 0x3aa   :  { %v973_v49 = vadd.f32 %v956_v51, %v937_v45  ;;  %v974_v60 = vadd.f32 %v956_v51, %v938_v46  ;;  %v975_v4 = vadd.f32 %v956_v51, %v939_v56 }
 0x3ab   :  { %v1072_v0 = vpop.eup %1071  ;;  %v976_v5 = vadd.f32 %v956_v51, %v940_v61  ;;  %v885_v51 = vsub.f32 %v1461_v1, %v1527_v19  ;;  %v890_v1 = vsub.f32 %v1468_v6, %v1529_v21 }
 0x3ac   :  { %v905_v9 = vmul.f32 %v1072_v0, %v881_v63  ;;  %v906_v10 = vmul.f32 %v1072_v0, %v882_v37  ;;  %v907_v17 = vmul.f32 %v1072_v0, %v883_v35  ;;  %v908_v23 = vmul.f32 %v1072_v0, %v884_v42  ;;  %v971_v35 = vpop.permute.xlu0 %970 }
 0x3ad   :  { %v989_v11 = vmax.f32 %v973_v49, 0.0  ;;  %v990_v15 = vmax.f32 %v974_v60, 0.0  ;;  %v991_v50 = vmax.f32 %v975_v4, 0.0  ;;  %v992_v18 = vmax.f32 %v976_v5, 0.0 }
 0x3ae   :  { %v941_v41 = vmul.f32 %v1521_v47, %v905_v9  ;;  %v942_v40 = vmul.f32 %v1521_v47, %v906_v10  ;;  %v943_v62 = vmul.f32 %v1521_v47, %v907_v17  ;;  %v944_v8 = vmul.f32 %v1521_v47, %v908_v23 }
 0x3af   :  { %1005 = vst [vmem:[%s1629_s10] sm:$0xff] %v989_v11  ;;  %1006 = vst [vmem:[%s1629_s10 + $0x8] sm:$0xff] %v990_v15  ;;  %v886_v47 = vsub.f32 %v1463_v3, %v1527_v19  ;;  %v891_v3 = vsub.f32 %v1499_v58, %v1529_v21 }
 0x3b0   :  { %1045 = vst [vmem:[%s1629_s10 + $0x40] sm:$0xff] %v991_v50  ;;  %1046 = vst [vmem:[%s1629_s10 + $0x48] sm:$0xff] %v992_v18  ;;  %v977_v53 = vadd.f32 %v961_v16, %v941_v41  ;;  %v978_v22 = vadd.f32 %v961_v16, %v942_v40  ;;  %v979_v24 = vadd.f32 %v961_v16, %v943_v62 }
 0x3b1   :  { %v980_v26 = vadd.f32 %v961_v16, %v944_v8  ;;  %v1074_v27 = vpop.eup %1073 }
 0x3b2   :  { %v909_v25 = vmul.f32 %v1074_v27, %v885_v51  ;;  %v910_v19 = vmul.f32 %v1074_v27, %v886_v47  ;;  %v911_v57 = vmul.f32 %v1074_v27, %v887_v7  ;;  %v912_v12 = vmul.f32 %v1074_v27, %v888_v52 }
 0x3b3   :  { %v1076_v28 = vpop.eup %1075  ;;  %v993_v30 = vmax.f32 %v977_v53, 0.0  ;;  %v994_v20 = vmax.f32 %v978_v22, 0.0  ;;  %v995_v32 = vmax.f32 %v979_v24, 0.0  ;;  %v996_v33 = vmax.f32 %v980_v26, 0.0 }
 0x3b4   :  { %v945_v13 = vmul.f32 %v1523_v48, %v909_v25  ;;  %v946_v36 = vmul.f32 %v1523_v48, %v910_v19  ;;  %v947_v6 = vmul.f32 %v1523_v48, %v911_v57  ;;  %v948_v58 = vmul.f32 %v1523_v48, %v912_v12 }
 0x3b5   :  { %1007 = vst [vmem:[%s1629_s10 + $0x10] sm:$0xff] %v993_v30  ;;  %1008 = vst [vmem:[%s1629_s10 + $0x18] sm:$0xff] %v994_v20  ;;  %v913_v31 = vmul.f32 %v1076_v28, %v889_v29  ;;  %v914_v21 = vmul.f32 %v1076_v28, %v890_v1  ;;  %v915_v48 = vmul.f32 %v1076_v28, %v891_v3 }
 0x3b6   :  { %1047 = vst [vmem:[%s1629_s10 + $0x50] sm:$0xff] %v995_v32  ;;  %1048 = vst [vmem:[%s1629_s10 + $0x58] sm:$0xff] %v996_v33  ;;  %v916_v59 = vmul.f32 %v1076_v28, %v892_v14  ;;  %v981_v39 = vadd.f32 %v966_v38, %v945_v13  ;;  %v982_v34 = vadd.f32 %v966_v38, %v946_v36 }
 0x3b7   :  { %v983_v2 = vadd.f32 %v966_v38, %v947_v6  ;;  %v984_v54 = vadd.f32 %v966_v38, %v948_v58  ;;  %v949_v43 = vmul.f32 %v1525_v55, %v913_v31  ;;  %v950_v44 = vmul.f32 %v1525_v55, %v914_v21 }
 0x3b8   :  { %v951_v45 = vmul.f32 %v1525_v55, %v915_v48  ;;  %v952_v46 = vmul.f32 %v1525_v55, %v916_v59  ;;  %v997_v56 = vmax.f32 %v981_v39, 0.0  ;;  %v998_v61 = vmax.f32 %v982_v34, 0.0 }
 0x3b9   :  { %v999_v63 = vmax.f32 %v983_v2, 0.0  ;;  %v1000_v37 = vmax.f32 %v984_v54, 0.0  ;;  %v985_v42 = vadd.f32 %v971_v35, %v949_v43  ;;  %v986_v0 = vadd.f32 %v971_v35, %v950_v44 }
 0x3ba   :  { %v987_v49 = vadd.f32 %v971_v35, %v951_v45  ;;  %v988_v60 = vadd.f32 %v971_v35, %v952_v46  ;;  %1009 = vst [vmem:[%s1629_s10 + $0x20] sm:$0xff] %v997_v56  ;;  %1010 = vst [vmem:[%s1629_s10 + $0x28] sm:$0xff] %v998_v61 }
 0x3bb   :  { %1049 = vst [vmem:[%s1629_s10 + $0x60] sm:$0xff] %v999_v63  ;;  %1050 = vst [vmem:[%s1629_s10 + $0x68] sm:$0xff] %v1000_v37  ;;  %v1001_v55 = vmax.f32 %v985_v42, 0.0  ;;  %v1002_v4 = vmax.f32 %v986_v0, 0.0 }
 0x3bc   :  { %v1003_v5 = vmax.f32 %v987_v49, 0.0  ;;  %v1004_v9 = vmax.f32 %v988_v60, 0.0 }
 0x3bd   :  { %1011 = vst [vmem:[%s1629_s10 + $0x30] sm:$0xff] %v1001_v55  ;;  %1012 = vst [vmem:[%s1629_s10 + $0x38] sm:$0xff] %v1002_v4 }
 0x3be   :  { %1051 = vst [vmem:[%s1629_s10 + $0x70] sm:$0xff] %v1003_v5  ;;  %1052 = vst [vmem:[%s1629_s10 + $0x78] sm:$0xff] %v1004_v9 }

</bundles_post_ra>
